<compile_context>
chip_gen: v6e
topology: v6e:2x2x1
jax: 0.10.0
libtpu: 0.0.40
codegen_flags: <defaults>
</compile_context>

<pallas_src>
import functools

import jax
import jax.numpy as jnp
from jax import lax
from jax.experimental import pallas as pl
from jax.experimental.pallas import tpu as pltpu


def _round_up(x, m):
    return ((x + m - 1) // m) * m


def _choose_block_tokens(T, D, itemsize, requested):
    """Pick tokens-per-grid-step (always a multiple of 8)."""
    t8 = _round_up(max(T, 1), 8)
    if requested is not None:
        tb = max(8, _round_up(int(requested), 8))
    else:
        tb = 256  # larger block amortizes the ~0.35us/step overhead (v5e/v6e)
        # keep the double-buffered output block around <=8 MiB so it is safely
        # below v7x's 32 MiB scoped-VMEM default (128 MiB on v5e/v6e).
        cap = (8 << 20) // max(1, 2 * D * itemsize)
        tb = min(tb, max(8, (cap // 8) * 8))
        # guarantee >=2 grid steps where possible so ("parallel",) can shard
        # token blocks across the two TensorCores on v7x.
        if t8 >= 16:
            tb = min(tb, _round_up(-(-t8 // 2), 8))
    return min(tb, t8)


def _make_vmem_gather_kernel(tb, tail, nblocks):
    """Fast path: table resident in VMEM, per-row dynamic-sublane copy."""

    def kernel(ids_ref, w_ref, out_ref):
        i = pl.program_id(0)
        base = i * tb            # hoisted out of the row loop (tb is static)

        def gather_rows(n):      # n is a static Python int
            def body(t, carry):
                row = ids_ref[base + t]
                out_ref[pl.ds(t, 1), :] = w_ref[pl.ds(row, 1), :]
                return carry
            lax.fori_loop(0, n, body, 0, unroll=min(8, n))

        if tail == 0:
            gather_rows(tb)
        else:
            @pl.when(i < nblocks - 1)
            def _():
                gather_rows(tb)

            @pl.when(i == nblocks - 1)
            def _():
                gather_rows(tail)   # skip tail-padded tokens entirely

    return kernel


def _make_hbm_gather_kernel(tb, tail, nblocks):
    """Large-table path: one row-sized HBM->VMEM DMA per token."""

    def kernel(ids_ref, w_hbm, out_ref, sems):
        i = pl.program_id(0)
        base = i * tb            # hoisted out of the row loops (tb is static)
        sem = sems.at[0]         # single shared DMA semaphore (was (TB,) sems)

        def issue(n):            # start all row copies before any wait
            def body(t, carry):
                row = ids_ref[base + t]
                pltpu.make_async_copy(w_hbm.at[row], out_ref.at[t], sem).start()
                return carry
            lax.fori_loop(0, n, body, 0, unroll=min(8, n))

        def drain(n):
            # Conservative per-copy waits on the shared semaphore.  The wait
            # descriptor only needs the dst shape + sem, so a static (D,) VMEM
            # slice is used (no per-iteration address math).
            # TODO(synk): collapse into one aggregate wait over the whole
            # (tb, D) block once DMA-semaphore byte accounting is verified.
            def body(t, carry):
                pltpu.make_async_copy(out_ref.at[0], out_ref.at[0], sem).wait()
                return carry
            lax.fori_loop(0, n, body, 0, unroll=min(8, n))

        if tail == 0:
            issue(tb)
            drain(tb)
        else:
            @pl.when(i < nblocks - 1)
            def _():
                issue(tb)
                drain(tb)

            @pl.when(i == nblocks - 1)
            def _():
                issue(tail)      # skip tail-padded tokens: no wasted DMAs
                drain(tail)

    return kernel


@functools.partial(
    jax.jit,
    static_argnames=("block_tokens", "vmem_table_limit_bytes", "force_hbm_gather"),
)
def embedding_forward(ids, weight, *, block_tokens=None,
                      vmem_table_limit_bytes=8 * 1024 * 1024,
                      force_hbm_gather=False):
    """ids: (B, S) int -> (B, S, D) gather from weight (V, D)."""
    B, S = ids.shape
    V, D = weight.shape
    T = B * S
    itemsize = jnp.dtype(weight.dtype).itemsize

    tb = _choose_block_tokens(T, D, itemsize, block_tokens)
    t_pad = _round_up(T, tb)
    nblocks = t_pad // tb
    tail = T % tb                       # 0 => last block is full

    # NOTE: ids live in SMEM (scalar prefetch); fine for typical (B*S) sizes.
    ids_flat = ids.reshape(T).astype(jnp.int32)
    # Harden against out-of-range ids (torch raises; we clamp).
    ids_flat = jnp.clip(ids_flat, 0, V - 1)

    table_bytes = V * D * itemsize
    use_vmem_table = (not force_hbm_gather) and (table_bytes <= vmem_table_limit_bytes)

    cost = pl.CostEstimate(
        flops=0,
        transcendentals=0,
        bytes_accessed=2 * T * D * itemsize + T * 4,
    )
    cparams = pltpu.CompilerParams(dimension_semantics=("parallel",))

    if use_vmem_table:
        kernel = _make_vmem_gather_kernel(tb, tail, nblocks)
        grid_spec = pltpu.PrefetchScalarGridSpec(
            num_scalar_prefetch=1,                              # ids -> SMEM
            grid=(nblocks,),
            in_specs=[pl.BlockSpec((V, D), lambda i, ids: (0, 0))],  # table in VMEM
            out_specs=pl.BlockSpec((tb, D), lambda i, ids: (i, 0)),
        )
    else:
        kernel = _make_hbm_gather_kernel(tb, tail, nblocks)
        grid_spec = pltpu.PrefetchScalarGridSpec(
            num_scalar_prefetch=1,                              # ids -> SMEM
            grid=(nblocks,),
            in_specs=[pl.BlockSpec(memory_space=pl.ANY)],       # table stays in HBM
            out_specs=pl.BlockSpec((tb, D), lambda i, ids: (i, 0)),
            scratch_shapes=[pltpu.SemaphoreType.DMA((1,))],     # one shared DMA sem
        )

    out_flat = pl.pallas_call(
        kernel,
        out_shape=jax.ShapeDtypeStruct((t_pad, D), weight.dtype),
        grid_spec=grid_spec,
        compiler_params=cparams,
        cost_estimate=cost,
    )(ids_flat, weight)

    return out_flat[:T].reshape(B, S, D)


def init_embedding_weight(key, num_embeddings, embedding_dim, padding_idx=0):
    # matches reset_parameters(): normal(0, 1), then zero the padding row
    w = jax.random.normal(key, (num_embeddings, embedding_dim), dtype=jnp.float32)
    w = w.at[padding_idx].set(0.0)
    return w


if __name__ == "__main__":
    key = jax.random.PRNGKey(0)
    k_w, k_ids, k_ids2 = jax.random.split(key, 3)

    num_embeddings = 16   # vocabulary size
    embedding_dim = 32
    batch, seq = 2, 8

    weight = init_embedding_weight(k_w, num_embeddings, embedding_dim)
    ids = jax.random.randint(k_ids, (batch, seq), 0, num_embeddings, dtype=jnp.int32)

    # 1) fast path (VMEM-resident table), multi-step grid
    out = jax.block_until_ready(embedding_forward(ids, weight))
    ref = weight[ids]
    assert out.shape == (batch, seq, embedding_dim)
    assert jnp.allclose(out, ref, atol=1e-6)

    # 2) fast path with a ragged token count (exercises the static tail branch)
    ids2 = jax.random.randint(k_ids2, (3, 50), 0, num_embeddings, dtype=jnp.int32)
    out2 = jax.block_until_ready(embedding_forward(ids2, weight))
    assert out2.shape == (3, 50, embedding_dim)
    assert jnp.allclose(out2, weight[ids2], atol=1e-6)

    # 3) forced HBM row-gather path: full blocks + tail skip + shared DMA sem
    out3 = jax.block_until_ready(
        embedding_forward(ids2, weight, block_tokens=64, force_hbm_gather=True))
    assert jnp.allclose(out3, weight[ids2], atol=1e-6)

    print("KERNEL_OK")
</pallas_src>

<mosaic_0001>
module attributes {stable_mosaic.version = 11 : i64} {
  func.func @kernel(%arg0: i32, %arg1: memref<16xi32, #tpu.memory_space<smem>>, %arg2: memref<16x32xf32, #tpu.memory_space<vmem>>, %arg3: memref<8x32xf32, #tpu.memory_space<vmem>>) attributes {dimension_semantics = [#tpu.dimension_semantics<parallel>], iteration_bounds = array<i64: 2>, scalar_prefetch = 1 : i64, scratch_operands = 0 : i64, tpu.core_type = #tpu.core_type<tc>, window_params = [{pipeline_mode = #tpu.pipeline_mode<synchronous>, transform_indices = @transform_0, window_bounds = array<i64: 16, 32>}, {transform_indices = @transform_1, window_bounds = array<i64: 8, 32>}]} {
    %c8_i32 = arith.constant 8 : i32
    %0 = arith.muli %arg0, %c8_i32 : i32
    %c0_i32 = arith.constant 0 : i32
    %1 = arith.addi %0, %c0_i32 : i32
    %2 = arith.index_cast %1 : i32 to index
    %3 = memref.load %arg1[%2] : memref<16xi32, #tpu.memory_space<smem>>
    %4 = arith.index_cast %3 : i32 to index
    %c0 = arith.constant 0 : index
    %5 = vector.load %arg2[%4, %c0] : memref<16x32xf32, #tpu.memory_space<vmem>>, vector<1x32xf32>
    %6 = arith.index_cast %c0_i32 : i32 to index
    %c0_0 = arith.constant 0 : index
    %7 = vector.load %arg3[%6, %c0_0] : memref<8x32xf32, #tpu.memory_space<vmem>>, vector<1x32xf32>
    tpu.vector_store %arg3[%6, %c0_0], %5 {strides = array<i32>} : memref<8x32xf32, #tpu.memory_space<vmem>>, vector<1x32xf32>,
    %c1_i32 = arith.constant 1 : i32
    %8 = arith.addi %0, %c1_i32 : i32
    %9 = arith.index_cast %8 : i32 to index
    %10 = memref.load %arg1[%9] : memref<16xi32, #tpu.memory_space<smem>>
    %11 = arith.index_cast %10 : i32 to index
    %c0_1 = arith.constant 0 : index
    %12 = vector.load %arg2[%11, %c0_1] : memref<16x32xf32, #tpu.memory_space<vmem>>, vector<1x32xf32>
    %13 = arith.index_cast %c1_i32 : i32 to index
    %c0_2 = arith.constant 0 : index
    %14 = vector.load %arg3[%13, %c0_2] : memref<8x32xf32, #tpu.memory_space<vmem>>, vector<1x32xf32>
    tpu.vector_store %arg3[%13, %c0_2], %12 {strides = array<i32>} : memref<8x32xf32, #tpu.memory_space<vmem>>, vector<1x32xf32>,
    %c2_i32 = arith.constant 2 : i32
    %15 = arith.addi %0, %c2_i32 : i32
    %16 = arith.index_cast %15 : i32 to index
    %17 = memref.load %arg1[%16] : memref<16xi32, #tpu.memory_space<smem>>
    %18 = arith.index_cast %17 : i32 to index
    %c0_3 = arith.constant 0 : index
    %19 = vector.load %arg2[%18, %c0_3] : memref<16x32xf32, #tpu.memory_space<vmem>>, vector<1x32xf32>
    %20 = arith.index_cast %c2_i32 : i32 to index
    %c0_4 = arith.constant 0 : index
    %21 = vector.load %arg3[%20, %c0_4] : memref<8x32xf32, #tpu.memory_space<vmem>>, vector<1x32xf32>
    tpu.vector_store %arg3[%20, %c0_4], %19 {strides = array<i32>} : memref<8x32xf32, #tpu.memory_space<vmem>>, vector<1x32xf32>,
    %c3_i32 = arith.constant 3 : i32
    %22 = arith.addi %0, %c3_i32 : i32
    %23 = arith.index_cast %22 : i32 to index
    %24 = memref.load %arg1[%23] : memref<16xi32, #tpu.memory_space<smem>>
    %25 = arith.index_cast %24 : i32 to index
    %c0_5 = arith.constant 0 : index
    %26 = vector.load %arg2[%25, %c0_5] : memref<16x32xf32, #tpu.memory_space<vmem>>, vector<1x32xf32>
    %27 = arith.index_cast %c3_i32 : i32 to index
    %c0_6 = arith.constant 0 : index
    %28 = vector.load %arg3[%27, %c0_6] : memref<8x32xf32, #tpu.memory_space<vmem>>, vector<1x32xf32>
    tpu.vector_store %arg3[%27, %c0_6], %26 {strides = array<i32>} : memref<8x32xf32, #tpu.memory_space<vmem>>, vector<1x32xf32>,
    %c4_i32 = arith.constant 4 : i32
    %29 = arith.addi %0, %c4_i32 : i32
    %30 = arith.index_cast %29 : i32 to index
    %31 = memref.load %arg1[%30] : memref<16xi32, #tpu.memory_space<smem>>
    %32 = arith.index_cast %31 : i32 to index
    %c0_7 = arith.constant 0 : index
    %33 = vector.load %arg2[%32, %c0_7] : memref<16x32xf32, #tpu.memory_space<vmem>>, vector<1x32xf32>
    %34 = arith.index_cast %c4_i32 : i32 to index
    %c0_8 = arith.constant 0 : index
    %35 = vector.load %arg3[%34, %c0_8] : memref<8x32xf32, #tpu.memory_space<vmem>>, vector<1x32xf32>
    tpu.vector_store %arg3[%34, %c0_8], %33 {strides = array<i32>} : memref<8x32xf32, #tpu.memory_space<vmem>>, vector<1x32xf32>,
    %c5_i32 = arith.constant 5 : i32
    %36 = arith.addi %0, %c5_i32 : i32
    %37 = arith.index_cast %36 : i32 to index
    %38 = memref.load %arg1[%37] : memref<16xi32, #tpu.memory_space<smem>>
    %39 = arith.index_cast %38 : i32 to index
    %c0_9 = arith.constant 0 : index
    %40 = vector.load %arg2[%39, %c0_9] : memref<16x32xf32, #tpu.memory_space<vmem>>, vector<1x32xf32>
    %41 = arith.index_cast %c5_i32 : i32 to index
    %c0_10 = arith.constant 0 : index
    %42 = vector.load %arg3[%41, %c0_10] : memref<8x32xf32, #tpu.memory_space<vmem>>, vector<1x32xf32>
    tpu.vector_store %arg3[%41, %c0_10], %40 {strides = array<i32>} : memref<8x32xf32, #tpu.memory_space<vmem>>, vector<1x32xf32>,
    %c6_i32 = arith.constant 6 : i32
    %43 = arith.addi %0, %c6_i32 : i32
    %44 = arith.index_cast %43 : i32 to index
    %45 = memref.load %arg1[%44] : memref<16xi32, #tpu.memory_space<smem>>
    %46 = arith.index_cast %45 : i32 to index
    %c0_11 = arith.constant 0 : index
    %47 = vector.load %arg2[%46, %c0_11] : memref<16x32xf32, #tpu.memory_space<vmem>>, vector<1x32xf32>
    %48 = arith.index_cast %c6_i32 : i32 to index
    %c0_12 = arith.constant 0 : index
    %49 = vector.load %arg3[%48, %c0_12] : memref<8x32xf32, #tpu.memory_space<vmem>>, vector<1x32xf32>
    tpu.vector_store %arg3[%48, %c0_12], %47 {strides = array<i32>} : memref<8x32xf32, #tpu.memory_space<vmem>>, vector<1x32xf32>,
    %c7_i32 = arith.constant 7 : i32
    %50 = arith.addi %0, %c7_i32 : i32
    %51 = arith.index_cast %50 : i32 to index
    %52 = memref.load %arg1[%51] : memref<16xi32, #tpu.memory_space<smem>>
    %53 = arith.index_cast %52 : i32 to index
    %c0_13 = arith.constant 0 : index
    %54 = vector.load %arg2[%53, %c0_13] : memref<16x32xf32, #tpu.memory_space<vmem>>, vector<1x32xf32>
    %55 = arith.index_cast %c7_i32 : i32 to index
    %c0_14 = arith.constant 0 : index
    %56 = vector.load %arg3[%55, %c0_14] : memref<8x32xf32, #tpu.memory_space<vmem>>, vector<1x32xf32>
    tpu.vector_store %arg3[%55, %c0_14], %54 {strides = array<i32>} : memref<8x32xf32, #tpu.memory_space<vmem>>, vector<1x32xf32>,
    %c8_i32_15 = arith.constant 8 : i32
    return
  }
  func.func @transform_0(%arg0: i32, %arg1: memref<16xi32, #tpu.memory_space<smem>>) -> (i32, i32) {
    %c0_i32 = arith.constant 0 : i32
    %c0_i32_0 = arith.constant 0 : i32
    %c0_i32_1 = arith.constant 0 : i32
    return %c0_i32, %c0_i32_0 : i32, i32
  }
  func.func @transform_1(%arg0: i32, %arg1: memref<16xi32, #tpu.memory_space<smem>>) -> (i32, i32) {
    %c0_i32 = arith.constant 0 : i32
    %c0_i32_0 = arith.constant 0 : i32
    return %arg0, %c0_i32 : i32, i32
  }
}

</mosaic_0001>

<bundles_post_ra>
// kernel: embedding_forward.1
= control target key start
LH: loop header
LB: loop body
LE: loop exit
PB: predicated region body
PF: predicated region fallthrough
CT: control target
= control target key end

     0   :  { %s557_s0 = inlined_call_operand.vmem [shape: s32[16], index: 0, kind: input, shape index: {}]   ;;  %s558_s1 = inlined_call_operand.hbm [shape: f32[16,32], index: 1, kind: input, shape index: {}]   ;;  %s559_s2 = inlined_call_operand.hbm [shape: f32[16,32], index: 2, kind: output, shape index: {}]  }
   0x1   :  { %s7_s11 = sshll.u32 %s557_s0, 4  ;;  %s8_s11 = int_to_ptr.vmem [resolvable:$true] %s7_s11 }
   0x2   :  { %s303_s12 = scalar_lea.vmem %s8_s11, 16  ;;  %p308_p1 = scmp.lt.s32.totalorder %s8_s11, %s8_s11 }
   0x3   :  { %p304_p0 = scmp.ne.s32.totalorder %s8_s11, %s303_s12  ;;  %p309_p2 = scmp.lt.s32.totalorder %s303_s12, %s303_s12 }
   0x5   :  { %p310_p3 = por %p309_p2, %p308_p1 }
   0x7   :  { %p311_p4 = pnand %p310_p3, %p304_p0 }
   0x9   :  { %314 = shalt.err (!%p311_p4)  }
   0xa   :  { %s409_s13 = smov [#allocation3]  }
   0xb   :  { %10 = dma.vmem_to_smem %s8_s11, 16, %s409_s13, [#allocation2] }
   0xc   :  { %383 = dma.done.wait [#allocation2], 16 }
   0xd   :  { %384 = vsyncadd [#allocation2], 4294967280 }
   0xe   :  { %12 = sfence }
   0xf   :  { %13 = vsyncpa [#allocation5], 0 }
  0x10   :  { %14 = vsyncpa [#allocation6], 0 }
  0x11   :  { %16 = vsyncpa [#allocation6 + $0x1], 0  ;;  %s432_s14 = smov 0   ;;  %s434_s15 = smov 0  }
  0x12   :  { %s436_s0 = smov 0   ;;  %s438_s16 = smov 0  }
  0x13 LB: > { %s453_s17 = sadd.s32 4294967295, %s407_s16   ;;  %s239_s18 = sadd.s32 4294967294, %s407_s16   ;;  %s407_s16 = sphi %s438_s16, %s569_s16   ;;  %s403_s0 = sphi %s436_s0, %s568_s0   ;;  %s399_s15 = sphi %s434_s15, %s567_s15   ;;  %s395_s14 = sphi %s432_s14, %s566_s14  }
  0x14   : > { %s457_s19 = sadd.s32 1, %s407_s16   ;;  %s50_s20 = sadd.s32 1, %s403_s0 }
  0x15   : > { %s47_s21 = ssub.s32 %s407_s16, %s457_s19  ;;  %p60_p5 = scmp.ne.s32.totalorder %s403_s0, %s399_s15 }
  0x16   : > { %p48_p6 = scmp.eq.s32.totalorder %s47_s21, 0  ;;  %p61_p7 = scmp.eq.s32.totalorder %s453_s17, 1 }
  0x17   : > { %p66_p8 = scmp.ne.s32.totalorder %s399_s15, %s395_s14  ;;  %p67_p9 = scmp.eq.s32.totalorder %s239_s18, 1 }
  0x18   : > { %s468_s22 = scalar_select %p48_p6, %s403_s0, %s50_s20  }
  0x19   : > { %p470_p10 = por %p61_p7, %p60_p5  ;;  %p474_p11 = por %p67_p9, %p66_p8 }
  0x1a   : > { %p240_p12 = scmp.ge.s32.totalorder %s407_s16, 1  ;;  %p74_p13 = scmp.lt.s32.totalorder %s407_s16, 3 }
  0x1b   : > { %s562_s24 = scalar_select %p474_p11, 1, 0 }
  0x1c   : > { %p264_p0 = scmp.eq.s32.totalorder %s453_s17, 0  ;;  %p481_p1 = pnand %p240_p12, %p74_p13 }
  0x1d   : > { %s410_s26 = smov [#allocation4]  }
  0x1e   : > { %s86_s27 = sshll.u32 %s410_s26, 4  ;;  %p256_p2 = pneg %p481_p1  ;;  %s87_s27 = int_to_ptr.vmem [resolvable:$true] %s86_s27 }
  0x1f   : > { %s326_s28 = scalar_lea.vmem %s87_s27, 256  ;;  %p334_p8 = scmp.lt.s32.totalorder %s87_s27, %s87_s27 }
  0x20   : > { %p257_p3 = pnand %p264_p0, %p256_p2  ;;  %p327_p5 = scmp.ne.s32.totalorder %s87_s27, %s326_s28 }
  0x21   : > { %p335_p9 = scmp.lt.s32.totalorder %s326_s28, %s326_s28 }
  0x22   : > { %p317_p4 = pneg %p257_p3 }
  0x23   : > { %p336_p11 = por %p335_p9, %p334_p8 }
  0x24   : > { %p329_p6 = pnand %p327_p5, %p317_p4 }
  0x26   : > { %p330_p7 = pneg %p329_p6 }
  0x28   : > { %p337_p12 = pnand %p336_p11, %p330_p7 }
  0x2a   : > { %340 = shalt.err (!%p337_p12)
}
  0x2b   : > { %s411_s29 = smov 128   ;;  %s412_s30 = smov 8  }
  0x2c   : > { %259 = dma.hbm_to_vmem [thread:$0]  (!%p257_p3), %s558_s1, 256, %s87_s27, [#allocation5], %s411_s29, %s411_s29, %s412_s30  }
  0x2d   : > { %102 = sbr.rel (%p481_p1) target bundleno = 89 (0x59), region = 24 }
  0x32   : > { %386 = dma.done.wait (%p264_p0), [#allocation5], 256  }
  0x33   : > { %388 = vsyncadd (%p264_p0), [#allocation5], 4294967040  ;;  %s560_s5 = sand.u32 1, %s399_s15   ;;  %s245_s6 = sshll.u32 %s453_s17, 3  ;;  %vm121_vm0 = vcmask 253952  }
  0x34   : > { %s244_s7 = sshll.u32 %s560_s5, 3  ;;  %s118_s8 = sld [smem:[#allocation3 + %s245_s6]] }
  0x35   : > { %s123_s9 = sadd.s32 1, %s245_s6  ;;  %s128_s10 = sadd.s32 2, %s245_s6 }
  0x36   : > { %s124_s11 = sld [smem:[#allocation3 + %s123_s9]]  ;;  %s133_s12 = sadd.s32 3, %s245_s6 }
  0x37   : > { %s129_s13 = sld [smem:[#allocation3 + %s128_s10]]  ;;  %s138_s18 = sadd.s32 4, %s245_s6 }
  0x38   : > { %s134_s20 = sld [smem:[#allocation3 + %s133_s12]]  ;;  %s143_s21 = sadd.s32 5, %s245_s6 }
  0x39   : > { %s139_s25 = sld [smem:[#allocation3 + %s138_s18]]  ;;  %s148_s28 = sadd.s32 6, %s245_s6 }
  0x3a   : > { %s119_s26 = scalar_lea.vmem [#allocation4], %s118_s8  ;;  %s144_s27 = sld [smem:[#allocation3 + %s143_s21]] }
  0x3b   : > { %v120_v0 = vld [vmem:[%s119_s26] sm:$0x1]  ;;  %s116_s29 = scalar_lea.vmem [#allocation7], %s244_s7  ;;  %s149_s30 = sld [smem:[#allocation3 + %s148_s28]] }
  0x3c   : > { %122 = vst.msk [vmem:[%s116_s29] sm:$0x1] %vm121_vm0, %v120_v0  ;;  %s153_s3 = sadd.s32 7, %s245_s6  ;;  %s125_s5 = scalar_lea.vmem [#allocation4], %s124_s11 }
  0x3d   : > { %s154_s4 = sld [smem:[#allocation3 + %s153_s3]]  ;;  %v126_v1 = vld [vmem:[%s125_s5] sm:$0x1]  ;;  %s130_s9 = scalar_lea.vmem [#allocation4], %s129_s13 }
  0x3e   : > { %127 = vst.msk [vmem:[%s116_s29 + $0x1] sm:$0x1] %vm121_vm0, %v126_v1  ;;  %v131_v2 = vld [vmem:[%s130_s9] sm:$0x1]  ;;  %s247_s10 = sshll.u32 %s453_s17, 7  ;;  %s135_s12 = scalar_lea.vmem [#allocation4], %s134_s20 }
  0x3f   : > { %132 = vst.msk [vmem:[%s116_s29 + $0x2] sm:$0x1] %vm121_vm0, %v131_v2  ;;  %v136_v3 = vld [vmem:[%s135_s12] sm:$0x1]  ;;  %s172_s8 = sshll.u32 %s116_s29, 4  ;;  %s140_s7 = scalar_lea.vmem [#allocation4], %s139_s25  ;;  %s514_s8 = int_to_ptr.vmem [resolvable:$true] %s172_s8 }
  0x40   : > { %137 = vst.msk [vmem:[%s116_s29 + $0x3] sm:$0x1] %vm121_vm0, %v136_v3  ;;  %v141_v4 = vld [vmem:[%s140_s7] sm:$0x1]  ;;  %s145_s6 = scalar_lea.vmem [#allocation4], %s144_s27  ;;  %s511_s13 = scalar_lea.hbm %s559_s2, %s247_s10 }
  0x41   : > { %142 = vst.msk [vmem:[%s116_s29 + $0x4] sm:$0x1] %vm121_vm0, %v141_v4  ;;  %v146_v5 = vld [vmem:[%s145_s6] sm:$0x1]  ;;  %s150_s17 = scalar_lea.vmem [#allocation4], %s149_s30  ;;  %s564_s20 = sand.u32 1, %s399_s15  }
  0x42   : > { %147 = vst.msk [vmem:[%s116_s29 + $0x5] sm:$0x1] %vm121_vm0, %v146_v5  ;;  %v151_v6 = vld [vmem:[%s150_s17] sm:$0x1]  ;;  %s159_s21 = scalar_lea.sflag [#allocation6], %s564_s20  ;;  %s341_s25 = scalar_lea.vmem %s514_s8, 128 }
  0x43   : > { %152 = vst.msk [vmem:[%s116_s29 + $0x6] sm:$0x1] %vm121_vm0, %v151_v6  ;;  %s155_s18 = scalar_lea.vmem [#allocation4], %s154_s4  ;;  %p342_p11 = scmp.ne.s32.totalorder %s514_s8, %s341_s25 }
  0x44   : > { %v156_v7 = vld [vmem:[%s155_s18] sm:$0x1]  ;;  %s413_s26 = smov [#allocation7]  }
  0x45   : > { %157 = vst.msk [vmem:[%s116_s29 + $0x7] sm:$0x1] %vm121_vm0, %v156_v7  ;;  %p343_p13 = pnand %p342_p11, %p470_p10  ;;  %s345_s27 = sshll.u32 %s413_s26, 4  ;;  %s346_s27 = int_to_ptr.vmem [resolvable:$false] %s345_s27 }
  0x46   : > { %s347_s28 = scalar_lea.vmem %s346_s27, 256  ;;  %p348_p1 = scmp.lt.s32.totalorder %s514_s8, %s346_s27 }
  0x47   : > { %p344_p0 = pneg %p343_p13  ;;  %p349_p2 = scmp.lt.s32.totalorder %s347_s28, %s341_s25 }
  0x49   : > { %p350_p3 = por %p349_p2, %p348_p1 }
  0x4b   : > { %p351_p4 = pnand %p350_p3, %p344_p0 }
  0x4d   : > { %354 = shalt.err (!%p351_p4)
}
  0x4e   : > { %s355_s29 = scalar_lea.hbm %s511_s13, 128  ;;  %s359_s4 = scalar_lea.hbm %s559_s2, 256 }
  0x4f   : > { %p356_p5 = scmp.ne.s32.totalorder %s511_s13, %s355_s29  ;;  %p360_p8 = scmp.lt.s32.totalorder %s511_s13, %s559_s2 }
  0x50   : > { %p361_p9 = scmp.lt.s32.totalorder %s359_s4, %s355_s29 }
  0x51   : > { %p357_p6 = pnand %p356_p5, %p470_p10 }
  0x52   : > { %p362_p12 = por %p361_p9, %p360_p8 }
  0x53   : > { %p358_p7 = pneg %p357_p6 }
  0x55   : > { %p363_p11 = pnand %p362_p12, %p358_p7 }
  0x57   : > { %366 = shalt.err (!%p363_p11)
}
  0x58   : > { %254 = dma.vmem_to_hbm [thread:$0]  (%p470_p10), %s514_s8, 128, %s511_s13, %s159_s21  }
  0x59 PF: > { %p266_p13 = scmp.ge.s32.totalorder %s407_s16, 2  ;;  %s184_s12 = sand.u32 1, %s395_s14  }
  0x5a   : > { %p565_p0 = scmp.ne.s32.totalorder %s562_s24, 0  ;;  %s185_s7 = scalar_lea.sflag [#allocation6], %s184_s12 }
  0x5c   : > { %p261_p1 = pnand %p266_p13, %p565_p0 }
  0x5e   : > { %p262_p2 = pneg %p261_p1 }
  0x60   : > { %390 = dma.done.wait (%p262_p2), %s185_s7, 128  }
  0x61   : > { %392 = vsyncadd (%p262_p2), %s185_s7, 4294967168  ;;  %p19_p3 = scmp.ge.s32.totalorder %s457_s19, 4   ;;  %s566_s14 = smov %s399_s15 }
  0x62   : > { %s567_s15 = smov %s403_s0  ;;  %s568_s0 = smov %s468_s22 }
  0x63   : > { %s569_s16 = smov %s457_s19  ;;  %21 = sbr.rel (!%p19_p3) target bundleno = 19 (0x13), region = 69 }
  0x68   :  { %190 = vsyncpa [#allocation5], 1 }
  0x69   :  { %192 = vsyncpa [#allocation5 + $0x1], 1 }
  0x6a   :  { %193 = vsyncpa [#allocation6], 1 }
  0x6b   :  { %195 = vsyncpa [#allocation6 + $0x1], 1 }

</bundles_post_ra>
